<compile_context>
chip_gen: v6e
topology: v6e:2x2x1
jax: 0.10.0
libtpu: 0.0.40
codegen_flags: <defaults>
</compile_context>

<pallas_src>
import math
from functools import partial

import jax
import jax.numpy as jnp
from jax.experimental import pallas as pl
from jax.experimental.pallas import tpu as pltpu


# ----------------------------- tiling helpers -----------------------------

_VMEM_BUDGET = 16 * 1024 * 1024   # budget for double-buffered streamed blocks per call
_VMEM_LIMIT = 32 * 1024 * 1024    # scoped VMEM request; <= physical on v5e/v6e/v7x


def _cp(*sem):
    return pltpu.CompilerParams(dimension_semantics=sem, vmem_limit_bytes=_VMEM_LIMIT)


def _lcm(a, b):
    return a * b // math.gcd(a, b)


def _row_tile(R, M, n_streams, row_multiple, itemsize=4):
    """Largest divisor of R that is a multiple of `row_multiple` and keeps
    `n_streams` double-buffered (rb, M) blocks under the VMEM budget."""
    if R % row_multiple != 0:
        return R                       # full-extent block (legal; small shapes only)
    max_rows = max(row_multiple, _VMEM_BUDGET // (2 * n_streams * M * itemsize))
    best = row_multiple
    rb = row_multiple
    limit = min(R, max_rows)
    while rb <= limit:
        if R % rb == 0:
            best = rb
        rb += row_multiple
    return best


# ----------------------------- Pallas kernels -----------------------------

def _in_plain_kernel(x_ref, o_ref, *, eps):
    # affine-free instance norm over the lane (spatial) axis
    x = x_ref[...]
    mean = jnp.mean(x, axis=-1, keepdims=True)
    xc = x - mean
    var = jnp.mean(xc * xc, axis=-1, keepdims=True)
    o_ref[...] = (xc * jax.lax.rsqrt(var + eps)).astype(o_ref.dtype)


def _in_affine_kernel(x_ref, g_ref, b_ref, o_ref, *, eps):
    x = x_ref[...]
    mean = jnp.mean(x, axis=-1, keepdims=True)
    xc = x - mean
    var = jnp.mean(xc * xc, axis=-1, keepdims=True)
    o_ref[...] = (xc * jax.lax.rsqrt(var + eps) * g_ref[...] + b_ref[...]).astype(o_ref.dtype)


def _fused_res_double_norm_kernel(a_ref, t_ref, g1_ref, b1_ref, g2_ref, b2_ref,
                                  o1_ref, o2_ref, *, eps):
    # o1 = IN(attn + tokens) * g1 + b1 ; o2 = IN(o1) * g2 + b2   (one HBM pass)
    x = a_ref[...] + t_ref[...]
    mean = jnp.mean(x, axis=-1, keepdims=True)
    xc = x - mean
    var = jnp.mean(xc * xc, axis=-1, keepdims=True)
    y1 = xc * jax.lax.rsqrt(var + eps) * g1_ref[...] + b1_ref[...]
    o1_ref[...] = y1.astype(o1_ref.dtype)
    mean2 = jnp.mean(y1, axis=-1, keepdims=True)
    yc = y1 - mean2
    var2 = jnp.mean(yc * yc, axis=-1, keepdims=True)
    o2_ref[...] = (yc * jax.lax.rsqrt(var2 + eps) * g2_ref[...] + b2_ref[...]).astype(o2_ref.dtype)


def _fused_norm_add_kernel(x_ref, r_ref, g_ref, b_ref, o_ref, *, eps):
    # o = IN(x) * g + b + r   (residual folded into the norm kernel)
    x = x_ref[...]
    mean = jnp.mean(x, axis=-1, keepdims=True)
    xc = x - mean
    var = jnp.mean(xc * xc, axis=-1, keepdims=True)
    o_ref[...] = (xc * jax.lax.rsqrt(var + eps) * g_ref[...] + b_ref[...]
                  + r_ref[...]).astype(o_ref.dtype)


def _attention_kernel(q_ref, k_ref, v_ref, o_ref, *, scale):
    # blocks are (bh_tile, T, M): several batch-heads per grid step, batched MXU matmuls
    q = q_ref[...].astype(jnp.float32)
    k = k_ref[...].astype(jnp.float32)
    v = v_ref[...]
    s = jnp.einsum("btm,bsm->bts", q, k, preferred_element_type=jnp.float32) * scale
    s = s - jnp.max(s, axis=-1, keepdims=True)
    p = jnp.exp(s)
    inv = pl.reciprocal(jnp.sum(p, axis=-1, keepdims=True), approx=True)
    p = p * inv
    o_ref[...] = jnp.einsum("bts,bsm->btm", p.astype(v.dtype), v,
                            preferred_element_type=jnp.float32).astype(o_ref.dtype)


# ----------------------------- kernel wrappers -----------------------------

def _affine_block(vec, rb, C, dtype):
    # constant (rb, 1) block reused for every grid step (rb % C == 0 by construction)
    return jnp.tile(vec.astype(dtype), rb // C).reshape(rb, 1)


def instance_norm(x, gamma=None, beta=None, eps=1e-5):
    """nn.InstanceNorm2d semantics. x: (N, C, H, W); gamma/beta: (C,) or None."""
    N, C, H, W = x.shape
    R, M = N * C, H * W
    x2 = x.reshape(R, M)
    rb = _row_tile(R, M, n_streams=2, row_multiple=_lcm(8, C))
    x_spec = pl.BlockSpec((rb, M), lambda i: (i, 0))
    if gamma is None:
        out = pl.pallas_call(
            partial(_in_plain_kernel, eps=eps),
            out_shape=jax.ShapeDtypeStruct((R, M), x.dtype),
            grid=(R // rb,),
            in_specs=[x_spec],
            out_specs=x_spec,
            compiler_params=_cp("parallel"),
        )(x2)
    else:
        aff_spec = pl.BlockSpec((rb, 1), lambda i: (0, 0))   # fetched once
        out = pl.pallas_call(
            partial(_in_affine_kernel, eps=eps),
            out_shape=jax.ShapeDtypeStruct((R, M), x.dtype),
            grid=(R // rb,),
            in_specs=[x_spec, aff_spec, aff_spec],
            out_specs=x_spec,
            compiler_params=_cp("parallel"),
        )(x2, _affine_block(gamma, rb, C, x.dtype), _affine_block(beta, rb, C, x.dtype))
    return out.reshape(N, C, H, W)


def fused_residual_double_norm(attn, tokens, g1, b1, g2, b2, eps=1e-5):
    """Returns (IN(attn+tokens)*g1+b1, IN(of that)*g2+b2) in a single HBM pass."""
    N, C, H, W = attn.shape
    R, M = N * C, H * W
    rb = _row_tile(R, M, n_streams=4, row_multiple=_lcm(8, C))
    x_spec = pl.BlockSpec((rb, M), lambda i: (i, 0))
    aff_spec = pl.BlockSpec((rb, 1), lambda i: (0, 0))
    out1, out2 = pl.pallas_call(
        partial(_fused_res_double_norm_kernel, eps=eps),
        out_shape=(jax.ShapeDtypeStruct((R, M), attn.dtype),
                   jax.ShapeDtypeStruct((R, M), attn.dtype)),
        grid=(R // rb,),
        in_specs=[x_spec, x_spec, aff_spec, aff_spec, aff_spec, aff_spec],
        out_specs=(x_spec, x_spec),
        compiler_params=_cp("parallel"),
    )(attn.reshape(R, M), tokens.reshape(R, M),
      _affine_block(g1, rb, C, attn.dtype), _affine_block(b1, rb, C, attn.dtype),
      _affine_block(g2, rb, C, attn.dtype), _affine_block(b2, rb, C, attn.dtype))
    return out1.reshape(N, C, H, W), out2.reshape(N, C, H, W)


def fused_norm_add(x, res, gamma, beta, eps=1e-5):
    """IN(x)*gamma+beta + res in a single HBM pass."""
    N, C, H, W = x.shape
    R, M = N * C, H * W
    rb = _row_tile(R, M, n_streams=3, row_multiple=_lcm(8, C))
    x_spec = pl.BlockSpec((rb, M), lambda i: (i, 0))
    aff_spec = pl.BlockSpec((rb, 1), lambda i: (0, 0))
    out = pl.pallas_call(
        partial(_fused_norm_add_kernel, eps=eps),
        out_shape=jax.ShapeDtypeStruct((R, M), x.dtype),
        grid=(R // rb,),
        in_specs=[x_spec, x_spec, aff_spec, aff_spec],
        out_specs=x_spec,
        compiler_params=_cp("parallel"),
    )(x.reshape(R, M), res.reshape(R, M),
      _affine_block(gamma, rb, C, x.dtype), _affine_block(beta, rb, C, x.dtype))
    return out.reshape(N, C, H, W)


def token_attention(q, k, v, scale):
    """q/k/v: (B*heads, T, M) -> softmax(q k^T * scale) @ v, batched over batch-heads."""
    BH, T, M = q.shape
    itemsize = jnp.dtype(q.dtype).itemsize
    per_bh = 2 * 4 * T * M * itemsize          # double-buffered q/k/v/out per batch-head
    max_bh = max(1, _VMEM_BUDGET // per_bh)
    bh_tile = 1
    for c in range(1, min(BH, max_bh) + 1):
        if BH % c == 0:
            bh_tile = c
    spec = pl.BlockSpec((bh_tile, T, M), lambda i: (i, 0, 0))
    return pl.pallas_call(
        partial(_attention_kernel, scale=scale),
        out_shape=jax.ShapeDtypeStruct((BH, T, M), q.dtype),
        grid=(BH // bh_tile,),
        in_specs=[spec, spec, spec],
        out_specs=spec,
        compiler_params=_cp("parallel"),
    )(q, k, v)


# ------------------------------ JAX glue ops ------------------------------
# TODO(synk): FFT has no Pallas TPU equivalent; spectral-conv FFT + complex mode
#             mixing stay in plain JAX (channels are 1 here, so this is not the hot path).

def spectral_conv2d(x, w):
    """x: (N, Cin, H, W) f32; w: (Cin, Cout, m1, m2h) complex64; fft_norm='forward'."""
    N, Cin, H, W = x.shape
    Cout, m1, m2h = w.shape[1], w.shape[2], w.shape[3]
    xf = jnp.fft.rfft2(x, norm="forward")                 # (N, Cin, H, W//2+1)
    xf = jnp.fft.fftshift(xf, axes=-2)
    c0 = H // 2 - m1 // 2
    xs = xf[:, :, c0:c0 + m1, :m2h]
    of = jnp.einsum("nixy,ioxy->noxy", xs, w)
    out = jnp.zeros((N, Cout, H, W // 2 + 1), dtype=jnp.complex64)
    out = out.at[:, :, c0:c0 + m1, :m2h].set(of)
    out = jnp.fft.ifftshift(out, axes=-2)
    return jnp.fft.irfft2(out, s=(H, W), norm="forward").astype(x.dtype)


def conv1x1(x, w):
    """'linear' fno skip: 1x1 conv, bias=False. x: (N, Cin, H, W); w: (Cout, Cin)."""
    return jnp.einsum("oi,nihw->nohw", w, x)


def fno_block_kqv(x, p):
    # 1-layer FNOBlock: spectral conv + linear skip, no norm, identity activation.
    return spectral_conv2d(x, p["sw"]) + conv1x1(x, p["skip"])


def fno_mixer(x, layers):
    # 2-layer FNOBlock, norm='instance_norm' (affine-free), GELU between layers only.
    n = len(layers)
    for i, p in enumerate(layers):
        x_skip = conv1x1(x, p["skip"])
        x_fno = spectral_conv2d(x, p["sw"])
        x_fno = instance_norm(x_fno)                       # affine-free path
        x = x_fno + x_skip
        if i < n - 1:
            x = jax.nn.gelu(x, approximate=False)          # F.gelu default (exact erf)
    return x


# -------------------------- CODABlocks forward ----------------------------

def coda_blocks_forward(x, params, *, n_heads=1, token_codim=1, head_codim=1,
                        temperature=1.0):
    B, C, H, W = x.shape
    assert C % token_codim == 0
    T = C // token_codim
    M = head_codim * H * W

    tokens = x.reshape(B * T, token_codim, H, W)
    tokens_norm = instance_norm(tokens, params["norm1_g"], params["norm1_b"])

    # --- compute_attention ---
    k = fno_block_kqv(tokens_norm, params["key"])
    q = fno_block_kqv(tokens_norm, params["query"])
    v = fno_block_kqv(tokens_norm, params["value"])

    def to_bhtm(z):
        # (B*T, heads*d, H, W) -> (B*heads, T, d*H*W)
        return (z.reshape(B, T, n_heads, head_codim, H, W)
                 .transpose(0, 2, 1, 3, 4, 5)
                 .reshape(B * n_heads, T, head_codim * H * W))

    scale = 1.0 / (math.sqrt(M) * temperature)
    attn = token_attention(to_bhtm(q), to_bhtm(k), to_bhtm(v), scale)

    attn = (attn.reshape(B, n_heads, T, head_codim, H, W)
                .transpose(0, 2, 1, 3, 4, 5)
                .reshape(B * T, n_heads * head_codim, H, W))
    # n_heads * head_codim == token_codim  ->  multi_head_proj is None

    # fused: attention_normalizer(attn + tokens) and norm2(...) in one pass
    attn_res, attn_normalized = fused_residual_double_norm(
        attn, tokens,
        params["attn_norm_g"], params["attn_norm_b"],
        params["norm2_g"], params["norm2_b"])

    out = fno_mixer(attn_normalized, params["mixer"])
    # fused: mixer_out_normalizer(out) + attn_res in one pass
    out = fused_norm_add(out, attn_res, params["mix_out_g"], params["mix_out_b"])
    return out.reshape(B, T * token_codim, H, W)


# ------------------------------- params ------------------------------------

def init_params(key, n_heads, head_codim, token_codim, n_modes):
    m1, m2 = n_modes
    m2h = m2 // 2 + 1
    kqv_out = n_heads * head_codim

    def spec_w(k, cin, cout):
        kr, ki = jax.random.split(k)
        sc = 1.0 / (cin * cout)
        return (sc * jax.random.normal(kr, (cin, cout, m1, m2h))
                + 1j * sc * jax.random.normal(ki, (cin, cout, m1, m2h))).astype(jnp.complex64)

    def skip_w(k, cin, cout):
        return (jax.random.normal(k, (cout, cin)) / math.sqrt(cin)).astype(jnp.float32)

    ks = jax.random.split(key, 10)
    return {
        "key":   {"sw": spec_w(ks[0], token_codim, kqv_out), "skip": skip_w(ks[1], token_codim, kqv_out)},
        "query": {"sw": spec_w(ks[2], token_codim, kqv_out), "skip": skip_w(ks[3], token_codim, kqv_out)},
        "value": {"sw": spec_w(ks[4], token_codim, kqv_out), "skip": skip_w(ks[5], token_codim, kqv_out)},
        "mixer": [
            {"sw": spec_w(ks[6], token_codim, token_codim), "skip": skip_w(ks[7], token_codim, token_codim)},
            {"sw": spec_w(ks[8], token_codim, token_codim), "skip": skip_w(ks[9], token_codim, token_codim)},
        ],
        # InstanceNorm2d(token_codim, affine=True) default init (weight=1, bias=0)
        "norm1_g": jnp.ones((token_codim,), jnp.float32),
        "norm1_b": jnp.zeros((token_codim,), jnp.float32),
        "norm2_g": jnp.ones((token_codim,), jnp.float32),
        "norm2_b": jnp.zeros((token_codim,), jnp.float32),
        "attn_norm_g": jnp.ones((token_codim,), jnp.float32),
        "attn_norm_b": jnp.zeros((token_codim,), jnp.float32),
        "mix_out_g": jnp.ones((token_codim,), jnp.float32),
        "mix_out_b": jnp.zeros((token_codim,), jnp.float32),
    }


if __name__ == "__main__":
    B, T, H, W = 2, 8, 16, 16          # x: (B, T*token_codim, H, W), token_codim=1
    n_modes = (8, 8)

    key = jax.random.PRNGKey(0)
    kx, kp = jax.random.split(key)
    x = jax.random.normal(kx, (B, T, H, W), dtype=jnp.float32)
    params = init_params(kp, n_heads=1, head_codim=1, token_codim=1, n_modes=n_modes)

    fwd = jax.jit(partial(coda_blocks_forward, n_heads=1, token_codim=1,
                          head_codim=1, temperature=1.0))
    y = fwd(x, params)
    jax.block_until_ready(y)
    assert y.shape == (B, T, H, W) and y.dtype == jnp.float32
    assert bool(jnp.all(jnp.isfinite(y)))
    print("KERNEL_OK")
</pallas_src>

<mosaic_0001>
module attributes {stable_mosaic.version = 11 : i64} {
  func.func @_in_affine_kernel(%arg0: i32, %arg1: memref<16x256xf32, #tpu.memory_space<vmem>>, %arg2: memref<16x1xf32, #tpu.memory_space<vmem>>, %arg3: memref<16x1xf32, #tpu.memory_space<vmem>>, %arg4: memref<16x256xf32, #tpu.memory_space<vmem>>) attributes {dimension_semantics = [#tpu.dimension_semantics<parallel>], iteration_bounds = array<i64: 1>, scalar_prefetch = 0 : i64, scratch_operands = 0 : i64, tpu.core_type = #tpu.core_type<tc>, window_params = [{transform_indices = @transform_0, window_bounds = array<i64: 16, 256>}, {pipeline_mode = #tpu.pipeline_mode<synchronous>, transform_indices = @transform_1, window_bounds = array<i64: 16, 1>}, {pipeline_mode = #tpu.pipeline_mode<synchronous>, transform_indices = @transform_2, window_bounds = array<i64: 16, 1>}, {transform_indices = @transform_3, window_bounds = array<i64: 16, 256>}]} {
    %c0 = arith.constant 0 : index
    %c0_0 = arith.constant 0 : index
    %0 = vector.load %arg1[%c0, %c0_0] : memref<16x256xf32, #tpu.memory_space<vmem>>, vector<16x256xf32>
    %cst = arith.constant dense<0.000000e+00> : vector<16xf32>
    %1 = vector.multi_reduction <add>, %0, %cst [1] : vector<16x256xf32> to vector<16xf32>
    %2 = vector.shape_cast %1 : vector<16xf32> to vector<16x1xf32>
    %cst_1 = arith.constant 2.560000e+02 : f32
    %3 = vector.broadcast %cst_1 : f32 to vector<16x1xf32>
    %4 = arith.divf %2, %3 : vector<16x1xf32>
    %5 = vector.broadcast %4 : vector<16x1xf32> to vector<16x256xf32>
    %6 = arith.subf %0, %5 : vector<16x256xf32>
    %7 = arith.mulf %6, %6 : vector<16x256xf32>
    %cst_2 = arith.constant dense<0.000000e+00> : vector<16xf32>
    %8 = vector.multi_reduction <add>, %7, %cst_2 [1] : vector<16x256xf32> to vector<16xf32>
    %9 = vector.shape_cast %8 : vector<16xf32> to vector<16x1xf32>
    %cst_3 = arith.constant 2.560000e+02 : f32
    %10 = vector.broadcast %cst_3 : f32 to vector<16x1xf32>
    %11 = arith.divf %9, %10 : vector<16x1xf32>
    %cst_4 = arith.constant 9.99999974E-6 : f32
    %12 = vector.broadcast %cst_4 : f32 to vector<16x1xf32>
    %13 = arith.addf %11, %12 : vector<16x1xf32>
    %14 = math.rsqrt %13 : vector<16x1xf32>
    %15 = vector.broadcast %14 : vector<16x1xf32> to vector<16x256xf32>
    %16 = arith.mulf %6, %15 : vector<16x256xf32>
    %c0_5 = arith.constant 0 : index
    %c0_6 = arith.constant 0 : index
    %17 = vector.load %arg2[%c0_5, %c0_6] : memref<16x1xf32, #tpu.memory_space<vmem>>, vector<16x1xf32>
    %18 = vector.broadcast %17 : vector<16x1xf32> to vector<16x256xf32>
    %19 = arith.mulf %16, %18 : vector<16x256xf32>
    %c0_7 = arith.constant 0 : index
    %c0_8 = arith.constant 0 : index
    %20 = vector.load %arg3[%c0_7, %c0_8] : memref<16x1xf32, #tpu.memory_space<vmem>>, vector<16x1xf32>
    %21 = vector.broadcast %20 : vector<16x1xf32> to vector<16x256xf32>
    %22 = arith.addf %19, %21 : vector<16x256xf32>
    %c0_9 = arith.constant 0 : index
    %c0_10 = arith.constant 0 : index
    %23 = vector.load %arg4[%c0_9, %c0_10] : memref<16x256xf32, #tpu.memory_space<vmem>>, vector<16x256xf32>
    tpu.vector_store %arg4[%c0_9, %c0_10], %22 {strides = array<i32>} : memref<16x256xf32, #tpu.memory_space<vmem>>, vector<16x256xf32>,
    return
  }
  func.func @transform_0(%arg0: i32) -> (i32, i32) {
    %c0_i32 = arith.constant 0 : i32
    %c0_i32_0 = arith.constant 0 : i32
    return %arg0, %c0_i32 : i32, i32
  }
  func.func @transform_1(%arg0: i32) -> (i32, i32) {
    %c0_i32 = arith.constant 0 : i32
    %c0_i32_0 = arith.constant 0 : i32
    %c0_i32_1 = arith.constant 0 : i32
    return %c0_i32, %c0_i32_0 : i32, i32
  }
  func.func @transform_2(%arg0: i32) -> (i32, i32) {
    %c0_i32 = arith.constant 0 : i32
    %c0_i32_0 = arith.constant 0 : i32
    %c0_i32_1 = arith.constant 0 : i32
    return %c0_i32, %c0_i32_0 : i32, i32
  }
  func.func @transform_3(%arg0: i32) -> (i32, i32) {
    %c0_i32 = arith.constant 0 : i32
    %c0_i32_0 = arith.constant 0 : i32
    return %arg0, %c0_i32 : i32, i32
  }
}

module attributes {stable_mosaic.version = 11 : i64} {
  func.func @_attention_kernel(%arg0: i32, %arg1: memref<2x8x256xf32, #tpu.memory_space<vmem>>, %arg2: memref<2x8x256xf32, #tpu.memory_space<vmem>>, %arg3: memref<2x8x256xf32, #tpu.memory_space<vmem>>, %arg4: memref<2x8x256xf32, #tpu.memory_space<vmem>>) attributes {dimension_semantics = [#tpu.dimension_semantics<parallel>], iteration_bounds = array<i64: 1>, scalar_prefetch = 0 : i64, scratch_operands = 0 : i64, tpu.core_type = #tpu.core_type<tc>, window_params = [{transform_indices = @transform_0, window_bounds = array<i64: 2, 8, 256>}, {transform_indices = @transform_1, window_bounds = array<i64: 2, 8, 256>}, {transform_indices = @transform_2, window_bounds = array<i64: 2, 8, 256>}, {transform_indices = @transform_3, window_bounds = array<i64: 2, 8, 256>}]} {
    %c0 = arith.constant 0 : index
    %c0_0 = arith.constant 0 : index
    %c0_1 = arith.constant 0 : index
    %0 = vector.load %arg1[%c0, %c0_0, %c0_1] : memref<2x8x256xf32, #tpu.memory_space<vmem>>, vector<2x8x256xf32>
    %c0_2 = arith.constant 0 : index
    %c0_3 = arith.constant 0 : index
    %c0_4 = arith.constant 0 : index
    %1 = vector.load %arg2[%c0_2, %c0_3, %c0_4] : memref<2x8x256xf32, #tpu.memory_space<vmem>>, vector<2x8x256xf32>
    %c0_5 = arith.constant 0 : index
    %c0_6 = arith.constant 0 : index
    %c0_7 = arith.constant 0 : index
    %2 = vector.load %arg3[%c0_5, %c0_6, %c0_7] : memref<2x8x256xf32, #tpu.memory_space<vmem>>, vector<2x8x256xf32>
    "tpu.trace_start"() <{level = 10 : i32, message = "btm,bsm->bts"}> : () -> ()
    %cst = arith.constant dense<0.000000e+00> : vector<2x8x8xf32>
    %3 = tpu.matmul %0, %1, %cst {dimension_numbers = #tpu.dot_dimension_numbers<[2], [2], [1], [1], [0, 0, 0, 1, 1, 1], [0], [0]>} : vector<2x8x256xf32>, vector<2x8x256xf32>, vector<2x8x8xf32> -> vector<2x8x8xf32>
    "tpu.trace_stop"() : () -> ()
    %cst_8 = arith.constant 6.250000e-02 : f32
    %4 = vector.broadcast %cst_8 : f32 to vector<2x8x8xf32>
    %5 = arith.mulf %3, %4 : vector<2x8x8xf32>
    %cst_9 = arith.constant dense<0xFF800000> : vector<2x8xf32>
    %6 = vector.multi_reduction <maximumf>, %5, %cst_9 [2] : vector<2x8x8xf32> to vector<2x8xf32>
    %7 = vector.shape_cast %6 : vector<2x8xf32> to vector<2x8x1xf32>
    %8 = vector.broadcast %7 : vector<2x8x1xf32> to vector<2x8x8xf32>
    %9 = arith.subf %5, %8 : vector<2x8x8xf32>
    %10 = math.exp %9 : vector<2x8x8xf32>
    %cst_10 = arith.constant dense<0.000000e+00> : vector<2x8xf32>
    %11 = vector.multi_reduction <add>, %10, %cst_10 [2] : vector<2x8x8xf32> to vector<2x8xf32>
    %12 = vector.shape_cast %11 : vector<2x8xf32> to vector<2x8x1xf32>
    %13 = tpu.reciprocal %12 {approx = true} : vector<2x8x1xf32> -> vector<2x8x1xf32>
    %14 = vector.broadcast %13 : vector<2x8x1xf32> to vector<2x8x8xf32>
    %15 = arith.mulf %10, %14 : vector<2x8x8xf32>
    "tpu.trace_start"() <{level = 10 : i32, message = "bts,bsm->btm"}> : () -> ()
    %cst_11 = arith.constant dense<0.000000e+00> : vector<2x8x256xf32>
    %16 = tpu.matmul %15, %2, %cst_11 {dimension_numbers = #tpu.dot_dimension_numbers<[2], [1], [1], [2], [0, 0, 0, 1, 1, 2], [0], [0]>} : vector<2x8x8xf32>, vector<2x8x256xf32>, vector<2x8x256xf32> -> vector<2x8x256xf32>
    "tpu.trace_stop"() : () -> ()
    %c0_12 = arith.constant 0 : index
    %c0_13 = arith.constant 0 : index
    %c0_14 = arith.constant 0 : index
    %17 = vector.load %arg4[%c0_12, %c0_13, %c0_14] : memref<2x8x256xf32, #tpu.memory_space<vmem>>, vector<2x8x256xf32>
    tpu.vector_store %arg4[%c0_12, %c0_13, %c0_14], %16 {strides = array<i32>} : memref<2x8x256xf32, #tpu.memory_space<vmem>>, vector<2x8x256xf32>,
    return
  }
  func.func @transform_0(%arg0: i32) -> (i32, i32, i32) {
    %c0_i32 = arith.constant 0 : i32
    %c0_i32_0 = arith.constant 0 : i32
    %c0_i32_1 = arith.constant 0 : i32
    return %arg0, %c0_i32, %c0_i32_0 : i32, i32, i32
  }
  func.func @transform_1(%arg0: i32) -> (i32, i32, i32) {
    %c0_i32 = arith.constant 0 : i32
    %c0_i32_0 = arith.constant 0 : i32
    %c0_i32_1 = arith.constant 0 : i32
    return %arg0, %c0_i32, %c0_i32_0 : i32, i32, i32
  }
  func.func @transform_2(%arg0: i32) -> (i32, i32, i32) {
    %c0_i32 = arith.constant 0 : i32
    %c0_i32_0 = arith.constant 0 : i32
    %c0_i32_1 = arith.constant 0 : i32
    return %arg0, %c0_i32, %c0_i32_0 : i32, i32, i32
  }
  func.func @transform_3(%arg0: i32) -> (i32, i32, i32) {
    %c0_i32 = arith.constant 0 : i32
    %c0_i32_0 = arith.constant 0 : i32
    %c0_i32_1 = arith.constant 0 : i32
    return %arg0, %c0_i32, %c0_i32_0 : i32, i32, i32
  }
}

module attributes {stable_mosaic.version = 11 : i64} {
  func.func @_fused_res_double_norm_kernel(%arg0: i32, %arg1: memref<16x256xf32, #tpu.memory_space<vmem>>, %arg2: memref<16x256xf32, #tpu.memory_space<vmem>>, %arg3: memref<16x1xf32, #tpu.memory_space<vmem>>, %arg4: memref<16x1xf32, #tpu.memory_space<vmem>>, %arg5: memref<16x1xf32, #tpu.memory_space<vmem>>, %arg6: memref<16x1xf32, #tpu.memory_space<vmem>>, %arg7: memref<16x256xf32, #tpu.memory_space<vmem>>, %arg8: memref<16x256xf32, #tpu.memory_space<vmem>>) attributes {dimension_semantics = [#tpu.dimension_semantics<parallel>], iteration_bounds = array<i64: 1>, scalar_prefetch = 0 : i64, scratch_operands = 0 : i64, tpu.core_type = #tpu.core_type<tc>, window_params = [{transform_indices = @transform_0, window_bounds = array<i64: 16, 256>}, {transform_indices = @transform_1, window_bounds = array<i64: 16, 256>}, {pipeline_mode = #tpu.pipeline_mode<synchronous>, transform_indices = @transform_2, window_bounds = array<i64: 16, 1>}, {pipeline_mode = #tpu.pipeline_mode<synchronous>, transform_indices = @transform_3, window_bounds = array<i64: 16, 1>}, {pipeline_mode = #tpu.pipeline_mode<synchronous>, transform_indices = @transform_4, window_bounds = array<i64: 16, 1>}, {pipeline_mode = #tpu.pipeline_mode<synchronous>, transform_indices = @transform_5, window_bounds = array<i64: 16, 1>}, {transform_indices = @transform_6, window_bounds = array<i64: 16, 256>}, {transform_indices = @transform_7, window_bounds = array<i64: 16, 256>}]} {
    %c0 = arith.constant 0 : index
    %c0_0 = arith.constant 0 : index
    %0 = vector.load %arg1[%c0, %c0_0] : memref<16x256xf32, #tpu.memory_space<vmem>>, vector<16x256xf32>
    %c0_1 = arith.constant 0 : index
    %c0_2 = arith.constant 0 : index
    %1 = vector.load %arg2[%c0_1, %c0_2] : memref<16x256xf32, #tpu.memory_space<vmem>>, vector<16x256xf32>
    %2 = arith.addf %0, %1 : vector<16x256xf32>
    %cst = arith.constant dense<0.000000e+00> : vector<16xf32>
    %3 = vector.multi_reduction <add>, %2, %cst [1] : vector<16x256xf32> to vector<16xf32>
    %4 = vector.shape_cast %3 : vector<16xf32> to vector<16x1xf32>
    %cst_3 = arith.constant 2.560000e+02 : f32
    %5 = vector.broadcast %cst_3 : f32 to vector<16x1xf32>
    %6 = arith.divf %4, %5 : vector<16x1xf32>
    %7 = vector.broadcast %6 : vector<16x1xf32> to vector<16x256xf32>
    %8 = arith.subf %2, %7 : vector<16x256xf32>
    %9 = arith.mulf %8, %8 : vector<16x256xf32>
    %cst_4 = arith.constant dense<0.000000e+00> : vector<16xf32>
    %10 = vector.multi_reduction <add>, %9, %cst_4 [1] : vector<16x256xf32> to vector<16xf32>
    %11 = vector.shape_cast %10 : vector<16xf32> to vector<16x1xf32>
    %cst_5 = arith.constant 2.560000e+02 : f32
    %12 = vector.broadcast %cst_5 : f32 to vector<16x1xf32>
    %13 = arith.divf %11, %12 : vector<16x1xf32>
    %cst_6 = arith.constant 9.99999974E-6 : f32
    %14 = vector.broadcast %cst_6 : f32 to vector<16x1xf32>
    %15 = arith.addf %13, %14 : vector<16x1xf32>
    %16 = math.rsqrt %15 : vector<16x1xf32>
    %17 = vector.broadcast %16 : vector<16x1xf32> to vector<16x256xf32>
    %18 = arith.mulf %8, %17 : vector<16x256xf32>
    %c0_7 = arith.constant 0 : index
    %c0_8 = arith.constant 0 : index
    %19 = vector.load %arg3[%c0_7, %c0_8] : memref<16x1xf32, #tpu.memory_space<vmem>>, vector<16x1xf32>
    %20 = vector.broadcast %19 : vector<16x1xf32> to vector<16x256xf32>
    %21 = arith.mulf %18, %20 : vector<16x256xf32>
    %c0_9 = arith.constant 0 : index
    %c0_10 = arith.constant 0 : index
    %22 = vector.load %arg4[%c0_9, %c0_10] : memref<16x1xf32, #tpu.memory_space<vmem>>, vector<16x1xf32>
    %23 = vector.broadcast %22 : vector<16x1xf32> to vector<16x256xf32>
    %24 = arith.addf %21, %23 : vector<16x256xf32>
    %c0_11 = arith.constant 0 : index
    %c0_12 = arith.constant 0 : index
    %25 = vector.load %arg7[%c0_11, %c0_12] : memref<16x256xf32, #tpu.memory_space<vmem>>, vector<16x256xf32>
    tpu.vector_store %arg7[%c0_11, %c0_12], %24 {strides = array<i32>} : memref<16x256xf32, #tpu.memory_space<vmem>>, vector<16x256xf32>,
    %cst_13 = arith.constant dense<0.000000e+00> : vector<16xf32>
    %26 = vector.multi_reduction <add>, %24, %cst_13 [1] : vector<16x256xf32> to vector<16xf32>
    %27 = vector.shape_cast %26 : vector<16xf32> to vector<16x1xf32>
    %cst_14 = arith.constant 2.560000e+02 : f32
    %28 = vector.broadcast %cst_14 : f32 to vector<16x1xf32>
    %29 = arith.divf %27, %28 : vector<16x1xf32>
    %30 = vector.broadcast %29 : vector<16x1xf32> to vector<16x256xf32>
    %31 = arith.subf %24, %30 : vector<16x256xf32>
    %32 = arith.mulf %31, %31 : vector<16x256xf32>
    %cst_15 = arith.constant dense<0.000000e+00> : vector<16xf32>
    %33 = vector.multi_reduction <add>, %32, %cst_15 [1] : vector<16x256xf32> to vector<16xf32>
    %34 = vector.shape_cast %33 : vector<16xf32> to vector<16x1xf32>
    %cst_16 = arith.constant 2.560000e+02 : f32
    %35 = vector.broadcast %cst_16 : f32 to vector<16x1xf32>
    %36 = arith.divf %34, %35 : vector<16x1xf32>
    %cst_17 = arith.constant 9.99999974E-6 : f32
    %37 = vector.broadcast %cst_17 : f32 to vector<16x1xf32>
    %38 = arith.addf %36, %37 : vector<16x1xf32>
    %39 = math.rsqrt %38 : vector<16x1xf32>
    %40 = vector.broadcast %39 : vector<16x1xf32> to vector<16x256xf32>
    %41 = arith.mulf %31, %40 : vector<16x256xf32>
    %c0_18 = arith.constant 0 : index
    %c0_19 = arith.constant 0 : index
    %42 = vector.load %arg5[%c0_18, %c0_19] : memref<16x1xf32, #tpu.memory_space<vmem>>, vector<16x1xf32>
    %43 = vector.broadcast %42 : vector<16x1xf32> to vector<16x256xf32>
    %44 = arith.mulf %41, %43 : vector<16x256xf32>
    %c0_20 = arith.constant 0 : index
    %c0_21 = arith.constant 0 : index
    %45 = vector.load %arg6[%c0_20, %c0_21] : memref<16x1xf32, #tpu.memory_space<vmem>>, vector<16x1xf32>
    %46 = vector.broadcast %45 : vector<16x1xf32> to vector<16x256xf32>
    %47 = arith.addf %44, %46 : vector<16x256xf32>
    %c0_22 = arith.constant 0 : index
    %c0_23 = arith.constant 0 : index
    %48 = vector.load %arg8[%c0_22, %c0_23] : memref<16x256xf32, #tpu.memory_space<vmem>>, vector<16x256xf32>
    tpu.vector_store %arg8[%c0_22, %c0_23], %47 {strides = array<i32>} : memref<16x256xf32, #tpu.memory_space<vmem>>, vector<16x256xf32>,
    return
  }
  func.func @transform_0(%arg0: i32) -> (i32, i32) {
    %c0_i32 = arith.constant 0 : i32
    %c0_i32_0 = arith.constant 0 : i32
    return %arg0, %c0_i32 : i32, i32
  }
  func.func @transform_1(%arg0: i32) -> (i32, i32) {
    %c0_i32 = arith.constant 0 : i32
    %c0_i32_0 = arith.constant 0 : i32
    return %arg0, %c0_i32 : i32, i32
  }
  func.func @transform_2(%arg0: i32) -> (i32, i32) {
    %c0_i32 = arith.constant 0 : i32
    %c0_i32_0 = arith.constant 0 : i32
    %c0_i32_1 = arith.constant 0 : i32
    return %c0_i32, %c0_i32_0 : i32, i32
  }
  func.func @transform_3(%arg0: i32) -> (i32, i32) {
    %c0_i32 = arith.constant 0 : i32
    %c0_i32_0 = arith.constant 0 : i32
    %c0_i32_1 = arith.constant 0 : i32
    return %c0_i32, %c0_i32_0 : i32, i32
  }
  func.func @transform_4(%arg0: i32) -> (i32, i32) {
    %c0_i32 = arith.constant 0 : i32
    %c0_i32_0 = arith.constant 0 : i32
    %c0_i32_1 = arith.constant 0 : i32
    return %c0_i32, %c0_i32_0 : i32, i32
  }
  func.func @transform_5(%arg0: i32) -> (i32, i32) {
    %c0_i32 = arith.constant 0 : i32
    %c0_i32_0 = arith.constant 0 : i32
    %c0_i32_1 = arith.constant 0 : i32
    return %c0_i32, %c0_i32_0 : i32, i32
  }
  func.func @transform_6(%arg0: i32) -> (i32, i32) {
    %c0_i32 = arith.constant 0 : i32
    %c0_i32_0 = arith.constant 0 : i32
    return %arg0, %c0_i32 : i32, i32
  }
  func.func @transform_7(%arg0: i32) -> (i32, i32) {
    %c0_i32 = arith.constant 0 : i32
    %c0_i32_0 = arith.constant 0 : i32
    return %arg0, %c0_i32 : i32, i32
  }
}

module attributes {stable_mosaic.version = 11 : i64} {
  func.func @_in_plain_kernel(%arg0: i32, %arg1: memref<16x256xf32, #tpu.memory_space<vmem>>, %arg2: memref<16x256xf32, #tpu.memory_space<vmem>>) attributes {dimension_semantics = [#tpu.dimension_semantics<parallel>], iteration_bounds = array<i64: 1>, scalar_prefetch = 0 : i64, scratch_operands = 0 : i64, tpu.core_type = #tpu.core_type<tc>, window_params = [{transform_indices = @transform_0, window_bounds = array<i64: 16, 256>}, {transform_indices = @transform_1, window_bounds = array<i64: 16, 256>}]} {
    %c0 = arith.constant 0 : index
    %c0_0 = arith.constant 0 : index
    %0 = vector.load %arg1[%c0, %c0_0] : memref<16x256xf32, #tpu.memory_space<vmem>>, vector<16x256xf32>
    %cst = arith.constant dense<0.000000e+00> : vector<16xf32>
    %1 = vector.multi_reduction <add>, %0, %cst [1] : vector<16x256xf32> to vector<16xf32>
    %2 = vector.shape_cast %1 : vector<16xf32> to vector<16x1xf32>
    %cst_1 = arith.constant 2.560000e+02 : f32
    %3 = vector.broadcast %cst_1 : f32 to vector<16x1xf32>
    %4 = arith.divf %2, %3 : vector<16x1xf32>
    %5 = vector.broadcast %4 : vector<16x1xf32> to vector<16x256xf32>
    %6 = arith.subf %0, %5 : vector<16x256xf32>
    %7 = arith.mulf %6, %6 : vector<16x256xf32>
    %cst_2 = arith.constant dense<0.000000e+00> : vector<16xf32>
    %8 = vector.multi_reduction <add>, %7, %cst_2 [1] : vector<16x256xf32> to vector<16xf32>
    %9 = vector.shape_cast %8 : vector<16xf32> to vector<16x1xf32>
    %cst_3 = arith.constant 2.560000e+02 : f32
    %10 = vector.broadcast %cst_3 : f32 to vector<16x1xf32>
    %11 = arith.divf %9, %10 : vector<16x1xf32>
    %cst_4 = arith.constant 9.99999974E-6 : f32
    %12 = vector.broadcast %cst_4 : f32 to vector<16x1xf32>
    %13 = arith.addf %11, %12 : vector<16x1xf32>
    %14 = math.rsqrt %13 : vector<16x1xf32>
    %15 = vector.broadcast %14 : vector<16x1xf32> to vector<16x256xf32>
    %16 = arith.mulf %6, %15 : vector<16x256xf32>
    %c0_5 = arith.constant 0 : index
    %c0_6 = arith.constant 0 : index
    %17 = vector.load %arg2[%c0_5, %c0_6] : memref<16x256xf32, #tpu.memory_space<vmem>>, vector<16x256xf32>
    tpu.vector_store %arg2[%c0_5, %c0_6], %16 {strides = array<i32>} : memref<16x256xf32, #tpu.memory_space<vmem>>, vector<16x256xf32>,
    return
  }
  func.func @transform_0(%arg0: i32) -> (i32, i32) {
    %c0_i32 = arith.constant 0 : i32
    %c0_i32_0 = arith.constant 0 : i32
    return %arg0, %c0_i32 : i32, i32
  }
  func.func @transform_1(%arg0: i32) -> (i32, i32) {
    %c0_i32 = arith.constant 0 : i32
    %c0_i32_0 = arith.constant 0 : i32
    return %arg0, %c0_i32 : i32, i32
  }
}

module attributes {stable_mosaic.version = 11 : i64} {
  func.func @_fused_norm_add_kernel(%arg0: i32, %arg1: memref<16x256xf32, #tpu.memory_space<vmem>>, %arg2: memref<16x256xf32, #tpu.memory_space<vmem>>, %arg3: memref<16x1xf32, #tpu.memory_space<vmem>>, %arg4: memref<16x1xf32, #tpu.memory_space<vmem>>, %arg5: memref<16x256xf32, #tpu.memory_space<vmem>>) attributes {dimension_semantics = [#tpu.dimension_semantics<parallel>], iteration_bounds = array<i64: 1>, scalar_prefetch = 0 : i64, scratch_operands = 0 : i64, tpu.core_type = #tpu.core_type<tc>, window_params = [{transform_indices = @transform_0, window_bounds = array<i64: 16, 256>}, {transform_indices = @transform_1, window_bounds = array<i64: 16, 256>}, {pipeline_mode = #tpu.pipeline_mode<synchronous>, transform_indices = @transform_2, window_bounds = array<i64: 16, 1>}, {pipeline_mode = #tpu.pipeline_mode<synchronous>, transform_indices = @transform_3, window_bounds = array<i64: 16, 1>}, {transform_indices = @transform_4, window_bounds = array<i64: 16, 256>}]} {
    %c0 = arith.constant 0 : index
    %c0_0 = arith.constant 0 : index
    %0 = vector.load %arg1[%c0, %c0_0] : memref<16x256xf32, #tpu.memory_space<vmem>>, vector<16x256xf32>
    %cst = arith.constant dense<0.000000e+00> : vector<16xf32>
    %1 = vector.multi_reduction <add>, %0, %cst [1] : vector<16x256xf32> to vector<16xf32>
    %2 = vector.shape_cast %1 : vector<16xf32> to vector<16x1xf32>
    %cst_1 = arith.constant 2.560000e+02 : f32
    %3 = vector.broadcast %cst_1 : f32 to vector<16x1xf32>
    %4 = arith.divf %2, %3 : vector<16x1xf32>
    %5 = vector.broadcast %4 : vector<16x1xf32> to vector<16x256xf32>
    %6 = arith.subf %0, %5 : vector<16x256xf32>
    %7 = arith.mulf %6, %6 : vector<16x256xf32>
    %cst_2 = arith.constant dense<0.000000e+00> : vector<16xf32>
    %8 = vector.multi_reduction <add>, %7, %cst_2 [1] : vector<16x256xf32> to vector<16xf32>
    %9 = vector.shape_cast %8 : vector<16xf32> to vector<16x1xf32>
    %cst_3 = arith.constant 2.560000e+02 : f32
    %10 = vector.broadcast %cst_3 : f32 to vector<16x1xf32>
    %11 = arith.divf %9, %10 : vector<16x1xf32>
    %cst_4 = arith.constant 9.99999974E-6 : f32
    %12 = vector.broadcast %cst_4 : f32 to vector<16x1xf32>
    %13 = arith.addf %11, %12 : vector<16x1xf32>
    %14 = math.rsqrt %13 : vector<16x1xf32>
    %15 = vector.broadcast %14 : vector<16x1xf32> to vector<16x256xf32>
    %16 = arith.mulf %6, %15 : vector<16x256xf32>
    %c0_5 = arith.constant 0 : index
    %c0_6 = arith.constant 0 : index
    %17 = vector.load %arg3[%c0_5, %c0_6] : memref<16x1xf32, #tpu.memory_space<vmem>>, vector<16x1xf32>
    %18 = vector.broadcast %17 : vector<16x1xf32> to vector<16x256xf32>
    %19 = arith.mulf %16, %18 : vector<16x256xf32>
    %c0_7 = arith.constant 0 : index
    %c0_8 = arith.constant 0 : index
    %20 = vector.load %arg4[%c0_7, %c0_8] : memref<16x1xf32, #tpu.memory_space<vmem>>, vector<16x1xf32>
    %21 = vector.broadcast %20 : vector<16x1xf32> to vector<16x256xf32>
    %22 = arith.addf %19, %21 : vector<16x256xf32>
    %c0_9 = arith.constant 0 : index
    %c0_10 = arith.constant 0 : index
    %23 = vector.load %arg2[%c0_9, %c0_10] : memref<16x256xf32, #tpu.memory_space<vmem>>, vector<16x256xf32>
    %24 = arith.addf %22, %23 : vector<16x256xf32>
    %c0_11 = arith.constant 0 : index
    %c0_12 = arith.constant 0 : index
    %25 = vector.load %arg5[%c0_11, %c0_12] : memref<16x256xf32, #tpu.memory_space<vmem>>, vector<16x256xf32>
    tpu.vector_store %arg5[%c0_11, %c0_12], %24 {strides = array<i32>} : memref<16x256xf32, #tpu.memory_space<vmem>>, vector<16x256xf32>,
    return
  }
  func.func @transform_0(%arg0: i32) -> (i32, i32) {
    %c0_i32 = arith.constant 0 : i32
    %c0_i32_0 = arith.constant 0 : i32
    return %arg0, %c0_i32 : i32, i32
  }
  func.func @transform_1(%arg0: i32) -> (i32, i32) {
    %c0_i32 = arith.constant 0 : i32
    %c0_i32_0 = arith.constant 0 : i32
    return %arg0, %c0_i32 : i32, i32
  }
  func.func @transform_2(%arg0: i32) -> (i32, i32) {
    %c0_i32 = arith.constant 0 : i32
    %c0_i32_0 = arith.constant 0 : i32
    %c0_i32_1 = arith.constant 0 : i32
    return %c0_i32, %c0_i32_0 : i32, i32
  }
  func.func @transform_3(%arg0: i32) -> (i32, i32) {
    %c0_i32 = arith.constant 0 : i32
    %c0_i32_0 = arith.constant 0 : i32
    %c0_i32_1 = arith.constant 0 : i32
    return %c0_i32, %c0_i32_0 : i32, i32
  }
  func.func @transform_4(%arg0: i32) -> (i32, i32) {
    %c0_i32 = arith.constant 0 : i32
    %c0_i32_0 = arith.constant 0 : i32
    return %arg0, %c0_i32 : i32, i32
  }
}

</mosaic_0001>

<bundles_post_ra>
// kernel: tile.35
= control target key start
LH: loop header
LB: loop body
LE: loop exit
PB: predicated region body
PF: predicated region fallthrough
CT: control target
= control target key end

     0   :  { %s26_s0 = inlined_call_operand.<no memory space> [shape: f32[], index: 0, kind: input, shape index: {}]   ;;  %s27_s1 = inlined_call_operand.vmem [shape: f32[16,1], index: 1, kind: output, shape index: {}]  }
   0x1   :  { %v2_v0 = vstv %s26_s0 }
   0x2   :  { %3 = vst [vmem:[%s27_s1] sm:$0xff] %v2_v0  ;;  %6 = vst [vmem:[%s27_s1 + $0x8] sm:$0xff] %v2_v0 }

// kernel: coda_blocks_forward.6
= control target key start
LH: loop header
LB: loop body
LE: loop exit
PB: predicated region body
PF: predicated region fallthrough
CT: control target
= control target key end

     0   :  { %v98_v3 = vmov 0   ;;  %s155_s0 = inlined_call_operand.vmem [shape: f32[16,256], index: 0, kind: input, shape index: {}]   ;;  %s156_s1 = inlined_call_operand.vmem [shape: f32[16,1], index: 1, kind: input, shape index: {}]   ;;  %s157_s2 = inlined_call_operand.vmem [shape: f32[16,1], index: 2, kind: input, shape index: {}]   ;;  %s158_s3 = inlined_call_operand.vmem [shape: f32[16,256], index: 3, kind: output, shape index: {}]  }
   0x1   :  { %v14_v0 = vld [vmem:[%s155_s0] sm:$0xff]  ;;  %v15_v1 = vld [vmem:[%s155_s0 + $0x8] sm:$0xff]  ;;  %v16_v2 = vld [vmem:[%s155_s0 + $0x10] sm:$0xff]  ;;  %93 = vset.pattern.permute.xlu1 %v98_v3  ;;  %92 = vset.pattern.permute.xlu0 %v98_v3 }
   0x2   :  { %v18_v4 = vadd.f32 %v15_v1, %v14_v0  ;;  %v17_v5 = vld [vmem:[%s155_s0 + $0x18] sm:$0xff]  ;;  %v52_v6 = vld [vmem:[%s156_s1 + $0x8] sm:$0xff]  ;;  %v67_v8 = vld [vmem:[%s157_s2] sm:$0xff] }
   0x3   :  { %60 = vperm.xlu1 %93, %v52_v6   ;;  %v21_v7 = vadd.f32 %v17_v5, %v16_v2  ;;  %v51_v9 = vld [vmem:[%s156_s1] sm:$0xff]  ;;  %v68_v24 = vld [vmem:[%s157_s2 + $0x8] sm:$0xff] }
   0x4   :  { %19 = vadd.xlane.f32.xlu0 %v18_v4 }
   0x7   :  { %71 = vperm.xlu1 %93, %v67_v8  }
   0x8   :  { %22 = vadd.xlane.f32.xlu0 %v21_v7 }
  0x1e   :  { %55 = vperm.xlu0 %92, %v51_v9  }
  0x7e   :  { %v61_v25 = vpop.permute.xlu1 %60 }
  0x82   :  { %v72_v26 = vpop.permute.xlu1 %71 }
  0x8d   :  { %v20_v10 = vpop.xlane.xlu0 %19 }
  0x8e   :  { %v25_v11 = vmul.f32 0.00390625, %v20_v10 }
  0x90   :  { %v27_v12 = vsub.f32 %v14_v0, %v25_v11  ;;  %v28_v13 = vsub.f32 %v15_v1, %v25_v11 }
  0x91   :  { %v23_v14 = vpop.xlane.xlu0 %22 }
  0x92   :  { %v26_v15 = vmul.f32 0.00390625, %v23_v14  ;;  %v31_v16 = vmul.f32 %v27_v12, %v27_v12  ;;  %v32_v17 = vmul.f32 %v28_v13, %v28_v13 }
  0x94   :  { %v29_v18 = vsub.f32 %v16_v2, %v26_v15  ;;  %v30_v19 = vsub.f32 %v17_v5, %v26_v15  ;;  %v35_v20 = vadd.f32 %v32_v17, %v31_v16 }
  0x96   :  { %36 = vadd.xlane.f32.xlu1 %v35_v20  ;;  %v33_v21 = vmul.f32 %v29_v18, %v29_v18  ;;  %v34_v22 = vmul.f32 %v30_v19, %v30_v19 }
  0x98   :  { %v38_v23 = vadd.f32 %v34_v22, %v33_v21 }
  0x99   :  { %v56_v34 = vpop.permute.xlu0 %55 }
  0x9a   :  { %39 = vadd.xlane.f32.xlu1 %v38_v23 }
  0xab   :  { %76 = vperm.xlu1 %93, %v68_v24  }
 0x11f   :  { %v37_v27 = vpop.xlane.xlu1 %36 }
 0x120   :  { %v41_v28 = vmul.f32 0.00390625, %v37_v27 }
 0x122   :  { %v43_v29 = vadd.f32 1e-05, %v41_v28 }
 0x123   :  { %v40_v30 = vpop.xlane.xlu1 %39 }
 0x124   :  { %94 = vrsqrt.f32 %v43_v29  ;;  %v42_v31 = vmul.f32 0.00390625, %v40_v30 }
 0x126   :  { %v44_v32 = vadd.f32 1e-05, %v42_v31 }
 0x127   :  { %v77_v46 = vpop.permute.xlu1 %76 }
 0x128   :  { %96 = vrsqrt.f32 %v44_v32 }
 0x131   :  { %v95_v33 = vpop.eup %94 }
 0x132   :  { %v47_v35 = vmul.f32 %v95_v33, %v27_v12  ;;  %v48_v36 = vmul.f32 %v95_v33, %v28_v13 }
 0x134   :  { %v63_v37 = vmul.f32 %v56_v34, %v47_v35  ;;  %v64_v38 = vmul.f32 %v56_v34, %v48_v36 }
 0x135   :  { %v97_v39 = vpop.eup %96 }
 0x136   :  { %v49_v40 = vmul.f32 %v97_v39, %v29_v18  ;;  %v50_v41 = vmul.f32 %v97_v39, %v30_v19  ;;  %v79_v42 = vadd.f32 %v72_v26, %v63_v37  ;;  %v80_v43 = vadd.f32 %v72_v26, %v64_v38 }
 0x138   :  { %v65_v44 = vmul.f32 %v61_v25, %v49_v40  ;;  %v66_v45 = vmul.f32 %v61_v25, %v50_v41  ;;  %83 = vst [vmem:[%s158_s3] sm:$0xff] %v79_v42  ;;  %84 = vst [vmem:[%s158_s3 + $0x8] sm:$0xff] %v80_v43 }
 0x13a   :  { %v81_v47 = vadd.f32 %v77_v46, %v65_v44  ;;  %v82_v48 = vadd.f32 %v77_v46, %v66_v45 }
 0x13c   :  { %85 = vst [vmem:[%s158_s3 + $0x10] sm:$0xff] %v81_v47  ;;  %86 = vst [vmem:[%s158_s3 + $0x18] sm:$0xff] %v82_v48 }

// kernel: custom-call.8
= control target key start
LH: loop header
LB: loop body
LE: loop exit
PB: predicated region body
PF: predicated region fallthrough
CT: control target
= control target key end

     0   :  { %s20_s0 = inlined_call_operand.vmem [shape: c64[1,1,8,5], index: 0, kind: input, shape index: {}]   ;;  %s21_s1 = inlined_call_operand.vmem [shape: f32[1,1,8,5], index: 1, kind: output, shape index: {}]  }
   0x1   :  { %v2_v0 = vld [vmem:[%s20_s0] sm:$0xff] }
   0x2   :  { %3 = vst [vmem:[%s21_s1] sm:$0xff] %v2_v0 }

// kernel: custom-call.9
= control target key start
LH: loop header
LB: loop body
LE: loop exit
PB: predicated region body
PF: predicated region fallthrough
CT: control target
= control target key end

     0   :  { %s22_s0 = inlined_call_operand.vmem [shape: c64[1,1,8,5], index: 0, kind: input, shape index: {}]   ;;  %s23_s1 = inlined_call_operand.vmem [shape: f32[1,1,8,5], index: 1, kind: output, shape index: {}]  }
   0x1   :  { %v5_v0 = vld [vmem:[%s22_s0 + $0x8] sm:$0xff] }
   0x2   :  { %4 = vst [vmem:[%s23_s1] sm:$0xff] %v5_v0 }

// kernel: reverse.14
= control target key start
LH: loop header
LB: loop body
LE: loop exit
PB: predicated region body
PF: predicated region fallthrough
CT: control target
= control target key end

     0   :  { %s176_s0 = inlined_call_operand.vmem [shape: f32[16,1,16,7], index: 0, kind: input, shape index: {}]   ;;  %s177_s1 = inlined_call_operand.vmem [shape: f32[16,1,16,7], index: 1, kind: output, shape index: {}]  }
   0x1   :  { %v56_v0 = vld [vmem:[%s176_s0 + $0x60] sm:$0xff]  ;;  %v57_v1 = vld [vmem:[%s176_s0 + $0x50] sm:$0xff]  ;;  %v68_v7 = vld [vmem:[%s176_s0 + $0x68] sm:$0xff] }
   0x2   :  { %v59_v2 = vld [vmem:[%s176_s0 + $0x40] sm:$0xff]  ;;  %4 = vst [vmem:[%s177_s1] sm:$0xff] %v56_v0  ;;  %58 = vst [vmem:[%s177_s1 + $0x10] sm:$0xff] %v57_v1  ;;  %v61_v3 = vld [vmem:[%s176_s0 + $0x30] sm:$0xff] }
   0x3   :  { %60 = vst [vmem:[%s177_s1 + $0x20] sm:$0xff] %v59_v2  ;;  %v63_v4 = vld [vmem:[%s176_s0 + $0x20] sm:$0xff]  ;;  %v65_v5 = vld [vmem:[%s176_s0 + $0x10] sm:$0xff]  ;;  %62 = vst [vmem:[%s177_s1 + $0x30] sm:$0xff] %v61_v3 }
   0x4   :  { %64 = vst [vmem:[%s177_s1 + $0x40] sm:$0xff] %v63_v4  ;;  %66 = vst [vmem:[%s177_s1 + $0x50] sm:$0xff] %v65_v5  ;;  %v25_v6 = vld [vmem:[%s176_s0] sm:$0xff]  ;;  %v70_v8 = vld [vmem:[%s176_s0 + $0x58] sm:$0xff] }
   0x5   :  { %67 = vst [vmem:[%s177_s1 + $0x60] sm:$0xff] %v25_v6  ;;  %69 = vst [vmem:[%s177_s1 + $0x8] sm:$0xff] %v68_v7  ;;  %v72_v9 = vld [vmem:[%s176_s0 + $0x48] sm:$0xff]  ;;  %v74_v10 = vld [vmem:[%s176_s0 + $0x38] sm:$0xff] }
   0x6   :  { %71 = vst [vmem:[%s177_s1 + $0x18] sm:$0xff] %v70_v8  ;;  %v76_v11 = vld [vmem:[%s176_s0 + $0x28] sm:$0xff]  ;;  %73 = vst [vmem:[%s177_s1 + $0x28] sm:$0xff] %v72_v9  ;;  %v78_v12 = vld [vmem:[%s176_s0 + $0x18] sm:$0xff] }
   0x7   :  { %75 = vst [vmem:[%s177_s1 + $0x38] sm:$0xff] %v74_v10  ;;  %77 = vst [vmem:[%s177_s1 + $0x48] sm:$0xff] %v76_v11  ;;  %v80_v13 = vld [vmem:[%s176_s0 + $0x8] sm:$0xff] }
   0x8   :  { %79 = vst [vmem:[%s177_s1 + $0x58] sm:$0xff] %v78_v12  ;;  %81 = vst [vmem:[%s177_s1 + $0x68] sm:$0xff] %v80_v13 }

// kernel: coda_blocks_forward.7
= control target key start
LH: loop header
LB: loop body
LE: loop exit
PB: predicated region body
PF: predicated region fallthrough
CT: control target
= control target key end

     0   :  { %vm168_vm0 = vcmask 64512   ;;  %v358_v28 = vmov 0.0   ;;  %s433_s1 = inlined_call_operand.vmem [shape: f32[2,8,256], index: 1, kind: input, shape index: {}]   ;;  %s434_s0 = inlined_call_operand.vmem [shape: f32[2,8,256], index: 0, kind: input, shape index: {}]   ;;  %s435_s2 = inlined_call_operand.vmem [shape: f32[2,8,256], index: 2, kind: input, shape index: {}]   ;;  %s436_s3 = inlined_call_operand.vmem [shape: f32[2,8,256], index: 3, kind: output, shape index: {}]  }
   0x1   :  { %v19_v0 = vld [vmem:[%s433_s1 + $0x8] sm:$0xff]  ;;  %v18_v1 = vld [vmem:[%s433_s1] sm:$0xff]  ;;  %v21_v2 = vld [vmem:[%s433_s1 + $0x18] sm:$0xff] }
   0x2   :  { %56 = vmatprep.subr.mxu0 %v19_v0  ;;  %126 = vmatprep.subr.mxu1 %v21_v2  ;;  %v15_v3 = vld [vmem:[%s434_s0 + $0x8] sm:$0xff]  ;;  %v20_v4 = vld [vmem:[%s433_s1 + $0x10] sm:$0xff]  ;;  %v14_v5 = vld [vmem:[%s434_s0] sm:$0xff] }
   0x3   :  { %57 = vmatpush1.xpose.msra.mxu0 %v18_v1  ;;  %90 = vmatprep.mubr.f32.mxu0 %v15_v3  ;;  %v17_v6 = vld [vmem:[%s434_s0 + $0x18] sm:$0xff]  ;;  %v16_v7 = vld [vmem:[%s434_s0 + $0x10] sm:$0xff]  ;;  %v23_v26 = vld [vmem:[%s435_s2 + $0x8] sm:$0xff] }
   0x4   :  { %127 = vmatpush1.xpose.msra.mxu1 %v20_v4  ;;  %160 = vmatprep.mubr.f32.mxu1 %v17_v6  ;;  %v22_v27 = vld [vmem:[%s435_s2] sm:$0xff]  ;;  %v25_v29 = vld [vmem:[%s435_s2 + $0x18] sm:$0xff]  ;;  %v24_v30 = vld [vmem:[%s435_s2 + $0x10] sm:$0xff] }
   0x5   :  { %224 = vmatprep.subr.mxu0 %v23_v26  ;;  %298 = vmatprep.subr.mxu1 %v25_v29 }
   0x6   :  { %91 = vmatmul.mubr.f32.vlgmr.msra.gmra.mxu0 %v14_v5 }
   0x7   :  { %161 = vmatmul.mubr.f32.vlgmr.msra.gmra.mxu1 %v16_v7  ;;  %258 = vmatprep.mubr.f32.mxu0 %v358_v28 }
   0x8   :  { %332 = vmatprep.mubr.f32.mxu1 %v358_v28  ;;  %225 = vmatpush1.msra.mxu0 %v22_v27 }
   0x9   :  { %299 = vmatpush1.msra.mxu1 %v24_v30 }
  0xc6   :  { %v92_v8 = vpop.f32.mrf.mxu0 }
  0xc7   :  { %v166_v9 = vmul.f32 0.0625, %v92_v8  ;;  %v162_v10 = vpop.f32.mrf.mxu1 }
  0xc8   :  { %v94_v11 = vpop.f32.mrf.mxu0  ;;  %v167_v12 = vmul.f32 0.0625, %v162_v10 }
  0xc9   :  { %v164_v13 = vpop.f32.mrf.mxu1  ;;  %v169_v14 = vsel %vm168_vm0, %v166_v9, -inf }
  0xca   :  { %170 = vmax.xlane.f32.xlu0 %v169_v14  ;;  %v172_v15 = vsel %vm168_vm0, %v167_v12, -inf }
  0xce   :  { %173 = vmax.xlane.f32.xlu0 %v172_v15 }
 0x153   :  { %v171_v16 = vpop.xlane.xlu0 %170 }
 0x154   :  { %v175_v17 = vsub.f32 %v166_v9, %v171_v16 }
 0x156   :  { %v177_v18 = vmul.f32 1.442695, %v175_v17 }
 0x157   :  { %v174_v19 = vpop.xlane.xlu0 %173 }
 0x158   :  { %350 = vpow2.f32 %v177_v18  ;;  %v176_v20 = vsub.f32 %v167_v12, %v174_v19 }
 0x15a   :  { %v179_v21 = vmul.f32 1.442695, %v176_v20 }
 0x15c   :  { %352 = vpow2.f32 %v179_v21 }
 0x165   :  { %v351_v22 = vpop.eup %350 }
 0x166   :  { %v181_v23 = vsel %vm168_vm0, %v351_v22, 0.0 }
 0x167   :  { %182 = vadd.xlane.f32.xlu1 %v181_v23 }
 0x169   :  { %v353_v24 = vpop.eup %352 }
 0x16a   :  { %v184_v25 = vsel %vm168_vm0, %v353_v24, 0.0 }
 0x16b   :  { %185 = vadd.xlane.f32.xlu1 %v184_v25 }
 0x1f0   :  { %v183_v31 = vpop.xlane.xlu1 %182 }
 0x1f1   :  { %354 = vrcp.f32 %v183_v31 }
 0x1f4   :  { %v186_v32 = vpop.xlane.xlu1 %185 }
 0x1f5   :  { %356 = vrcp.f32 %v186_v32 }
 0x1fe   :  { %v355_v33 = vpop.eup %354 }
 0x1ff   :  { %v189_v34 = vmul.f32 %v355_v33, %v351_v22 }
 0x201   :  { %347 = vmatmul.mubr.msk.f32.vlgmr.msra.gmra.mxu0 %vm168_vm0, %v189_v34 }
 0x202   :  { %v357_v35 = vpop.eup %356 }
 0x203   :  { %v190_v36 = vmul.f32 %v357_v35, %v353_v24 }
 0x205   :  { %348 = vmatmul.mubr.msk.f32.vlgmr.msra.gmra.mxu1 %vm168_vm0, %v190_v36 }
 0x2c1   :  { %v260_v37 = vpop.f32.mrf.mxu0 }
 0x2c2   :  { %339 = vst [vmem:[%s436_s3] sm:$0xff] %v260_v37 }
 0x2c3   :  { %v262_v38 = vpop.f32.mrf.mxu0 }
 0x2c4   :  { %340 = vst [vmem:[%s436_s3 + $0x8] sm:$0xff] %v262_v38 }
 0x2c5   :  { %v334_v39 = vpop.f32.mrf.mxu1 }
 0x2c6   :  { %341 = vst [vmem:[%s436_s3 + $0x10] sm:$0xff] %v334_v39 }
 0x2c7   :  { %v336_v40 = vpop.f32.mrf.mxu1 }
 0x2c8   :  { %342 = vst [vmem:[%s436_s3 + $0x18] sm:$0xff] %v336_v40 }

// kernel: coda_blocks_forward.8
= control target key start
LH: loop header
LB: loop body
LE: loop exit
PB: predicated region body
PF: predicated region fallthrough
CT: control target
= control target key end

     0   :  { %v193_v3 = vmov 0   ;;  %s306_s0 = inlined_call_operand.vmem [shape: f32[16,256], index: 0, kind: input, shape index: {}]   ;;  %s307_s1 = inlined_call_operand.vmem [shape: f32[16,256], index: 1, kind: input, shape index: {}]   ;;  %s308_s2 = inlined_call_operand.vmem [shape: f32[16,1], index: 2, kind: input, shape index: {}]   ;;  %s309_s3 = inlined_call_operand.vmem [shape: f32[16,1], index: 3, kind: input, shape index: {}]   ;;  %s310_s6 = inlined_call_operand.vmem [shape: f32[16,256], index: 6, kind: output, shape index: {0}]   ;;  %s311_s4 = inlined_call_operand.vmem [shape: f32[16,1], index: 4, kind: input, shape index: {}]   ;;  %s312_s5 = inlined_call_operand.vmem [shape: f32[16,1], index: 5, kind: input, shape index: {}]   ;;  %s313_s7 = inlined_call_operand.vmem [shape: f32[16,256], index: 7, kind: output, shape index: {1}]  }
   0x1   :  { %v25_v0 = vld [vmem:[%s306_s0] sm:$0xff]  ;;  %v26_v1 = vld [vmem:[%s306_s0 + $0x8] sm:$0xff]  ;;  %184 = vset.pattern.permute.xlu1 %v193_v3  ;;  %183 = vset.pattern.permute.xlu0 %v193_v3  ;;  %v27_v6 = vld [vmem:[%s306_s0 + $0x10] sm:$0xff] }
   0x2   :  { %v29_v2 = vld [vmem:[%s307_s1] sm:$0xff]  ;;  %v30_v4 = vld [vmem:[%s307_s1 + $0x8] sm:$0xff]  ;;  %v28_v7 = vld [vmem:[%s306_s0 + $0x18] sm:$0xff] }
   0x3   :  { %v33_v5 = vadd.f32 %v29_v2, %v25_v0  ;;  %v34_v8 = vadd.f32 %v30_v4, %v26_v1  ;;  %v31_v9 = vld [vmem:[%s307_s1 + $0x10] sm:$0xff]  ;;  %v32_v10 = vld [vmem:[%s307_s1 + $0x18] sm:$0xff]  ;;  %v71_v11 = vld [vmem:[%s308_s2 + $0x8] sm:$0xff] }
   0x4   :  { %v35_v12 = vadd.f32 %v31_v9, %v27_v6  ;;  %v36_v13 = vadd.f32 %v32_v10, %v28_v7  ;;  %79 = vperm.xlu1 %184, %v71_v11   ;;  %v86_v15 = vld [vmem:[%s309_s3] sm:$0xff]  ;;  %v87_v32 = vld [vmem:[%s309_s3 + $0x8] sm:$0xff] }
   0x5   :  { %v37_v14 = vadd.f32 %v34_v8, %v33_v5  ;;  %v70_v17 = vld [vmem:[%s308_s2] sm:$0xff]  ;;  %v139_v61 = vld [vmem:[%s311_s4 + $0x8] sm:$0xff] }
   0x6   :  { %v40_v16 = vadd.f32 %v36_v13, %v35_v12  ;;  %v138_v59 = vld [vmem:[%s311_s4] sm:$0xff] }
   0x7   :  { %38 = vadd.xlane.f32.xlu0 %v37_v14  ;;  %v154_v60 = vld [vmem:[%s312_s5] sm:$0xff] }
   0x8   :  { %90 = vperm.xlu1 %184, %v86_v15  }
   0xb   :  { %41 = vadd.xlane.f32.xlu0 %v40_v16 }
  0x21   :  { %74 = vperm.xlu0 %183, %v70_v17  }
  0x7f   :  { %v80_v33 = vpop.permute.xlu1 %79 }
  0x83   :  { %v91_v34 = vpop.permute.xlu1 %90 }
  0x90   :  { %v39_v18 = vpop.xlane.xlu0 %38 }
  0x91   :  { %v44_v19 = vmul.f32 0.00390625, %v39_v18 }
  0x93   :  { %v46_v20 = vsub.f32 %v33_v5, %v44_v19  ;;  %v47_v21 = vsub.f32 %v34_v8, %v44_v19 }
  0x94   :  { %v42_v22 = vpop.xlane.xlu0 %41 }
  0x95   :  { %v45_v23 = vmul.f32 0.00390625, %v42_v22  ;;  %v50_v24 = vmul.f32 %v46_v20, %v46_v20  ;;  %v51_v25 = vmul.f32 %v47_v21, %v47_v21 }
  0x97   :  { %v48_v26 = vsub.f32 %v35_v12, %v45_v23  ;;  %v49_v27 = vsub.f32 %v36_v13, %v45_v23  ;;  %v54_v28 = vadd.f32 %v51_v25, %v50_v24  ;;  %v155_v12 = vld [vmem:[%s312_s5 + $0x8] sm:$0xff] }
  0x99   :  { %55 = vadd.xlane.f32.xlu1 %v54_v28  ;;  %v52_v29 = vmul.f32 %v48_v26, %v48_v26  ;;  %v53_v30 = vmul.f32 %v49_v27, %v49_v27 }
  0x9b   :  { %v57_v31 = vadd.f32 %v53_v30, %v52_v29 }
  0x9c   :  { %v75_v42 = vpop.permute.xlu0 %74 }
  0x9d   :  { %58 = vadd.xlane.f32.xlu1 %v57_v31 }
  0xae   :  { %95 = vperm.xlu1 %184, %v87_v32  }
 0x122   :  { %v56_v35 = vpop.xlane.xlu1 %55 }
 0x123   :  { %v60_v36 = vmul.f32 0.00390625, %v56_v35 }
 0x125   :  { %v62_v37 = vadd.f32 1e-05, %v60_v36 }
 0x126   :  { %v59_v38 = vpop.xlane.xlu1 %58 }
 0x127   :  { %185 = vrsqrt.f32 %v62_v37  ;;  %v61_v39 = vmul.f32 0.00390625, %v59_v38 }
 0x129   :  { %v63_v40 = vadd.f32 1e-05, %v61_v39 }
 0x12a   :  { %v96_v55 = vpop.permute.xlu1 %95 }
 0x12b   :  { %187 = vrsqrt.f32 %v63_v40 }
 0x134   :  { %v186_v41 = vpop.eup %185 }
 0x135   :  { %v66_v43 = vmul.f32 %v186_v41, %v46_v20  ;;  %v67_v44 = vmul.f32 %v186_v41, %v47_v21 }
 0x137   :  { %v82_v45 = vmul.f32 %v75_v42, %v66_v43  ;;  %v83_v46 = vmul.f32 %v75_v42, %v67_v44 }
 0x138   :  { %v188_v47 = vpop.eup %187 }
 0x139   :  { %v68_v48 = vmul.f32 %v188_v47, %v48_v26  ;;  %v69_v49 = vmul.f32 %v188_v47, %v49_v27  ;;  %v98_v50 = vadd.f32 %v91_v34, %v82_v45  ;;  %v99_v51 = vadd.f32 %v91_v34, %v83_v46 }
 0x13b   :  { %v84_v52 = vmul.f32 %v80_v33, %v68_v48  ;;  %v85_v53 = vmul.f32 %v80_v33, %v69_v49  ;;  %102 = vst [vmem:[%s310_s6] sm:$0xff] %v98_v50  ;;  %103 = vst [vmem:[%s310_s6 + $0x8] sm:$0xff] %v99_v51  ;;  %v106_v54 = vadd.f32 %v99_v51, %v98_v50 }
 0x13d   :  { %v100_v56 = vadd.f32 %v96_v55, %v84_v52  ;;  %v101_v57 = vadd.f32 %v96_v55, %v85_v53  ;;  %107 = vadd.xlane.f32.xlu1 %v106_v54 }
 0x13f   :  { %104 = vst [vmem:[%s310_s6 + $0x10] sm:$0xff] %v100_v56  ;;  %105 = vst [vmem:[%s310_s6 + $0x18] sm:$0xff] %v101_v57  ;;  %v109_v58 = vadd.f32 %v101_v57, %v100_v56 }
 0x141   :  { %110 = vadd.xlane.f32.xlu0 %v109_v58 }
 0x14e   :  { %142 = vperm.xlu1 %184, %v138_v59  }
 0x152   :  { %158 = vperm.xlu1 %184, %v154_v60  }
 0x157   :  { %147 = vperm.xlu0 %183, %v139_v61  }
 0x1c6   :  { %v108_v62 = vpop.xlane.xlu1 %107 }
 0x1c7   :  { %v112_v63 = vmul.f32 0.00390625, %v108_v62 }
 0x1c9   :  { %v114_v0 = vsub.f32 %v98_v50, %v112_v63  ;;  %v115_v1 = vsub.f32 %v99_v51, %v112_v63 }
 0x1ca   :  { %v111_v2 = vpop.xlane.xlu0 %110  ;;  %v143_v13 = vpop.permute.xlu1 %142 }
 0x1cb   :  { %v113_v3 = vmul.f32 0.00390625, %v111_v2  ;;  %v118_v4 = vmul.f32 %v114_v0, %v114_v0  ;;  %v119_v5 = vmul.f32 %v115_v1, %v115_v1 }
 0x1cd   :  { %v116_v6 = vsub.f32 %v100_v56, %v113_v3  ;;  %v117_v7 = vsub.f32 %v101_v57, %v113_v3  ;;  %v122_v8 = vadd.f32 %v119_v5, %v118_v4 }
 0x1ce   :  { %v159_v14 = vpop.permute.xlu1 %158 }
 0x1cf   :  { %123 = vadd.xlane.f32.xlu1 %v122_v8  ;;  %v120_v9 = vmul.f32 %v116_v6, %v116_v6  ;;  %v121_v10 = vmul.f32 %v117_v7, %v117_v7 }
 0x1d1   :  { %v125_v11 = vadd.f32 %v121_v10, %v120_v9 }
 0x1d2   :  { %v148_v31 = vpop.permute.xlu0 %147 }
 0x1d3   :  { %126 = vadd.xlane.f32.xlu1 %v125_v11 }
 0x1e4   :  { %163 = vperm.xlu1 %184, %v155_v12  }
 0x258   :  { %v124_v15 = vpop.xlane.xlu1 %123 }
 0x259   :  { %v128_v16 = vmul.f32 0.00390625, %v124_v15 }
 0x25b   :  { %v130_v17 = vadd.f32 1e-05, %v128_v16 }
 0x25c   :  { %v127_v18 = vpop.xlane.xlu1 %126 }
 0x25d   :  { %189 = vrsqrt.f32 %v130_v17  ;;  %v129_v19 = vmul.f32 0.00390625, %v127_v18 }
 0x25f   :  { %v131_v20 = vadd.f32 1e-05, %v129_v19 }
 0x260   :  { %v164_v34 = vpop.permute.xlu1 %163 }
 0x261   :  { %191 = vrsqrt.f32 %v131_v20 }
 0x26a   :  { %v190_v21 = vpop.eup %189 }
 0x26b   :  { %v134_v22 = vmul.f32 %v190_v21, %v114_v0  ;;  %v135_v23 = vmul.f32 %v190_v21, %v115_v1 }
 0x26d   :  { %v150_v24 = vmul.f32 %v143_v13, %v134_v22  ;;  %v151_v25 = vmul.f32 %v143_v13, %v135_v23 }
 0x26e   :  { %v192_v26 = vpop.eup %191 }
 0x26f   :  { %v136_v27 = vmul.f32 %v192_v26, %v116_v6  ;;  %v137_v28 = vmul.f32 %v192_v26, %v117_v7  ;;  %v166_v29 = vadd.f32 %v159_v14, %v150_v24  ;;  %v167_v30 = vadd.f32 %v159_v14, %v151_v25 }
 0x271   :  { %170 = vst [vmem:[%s313_s7] sm:$0xff] %v166_v29  ;;  %171 = vst [vmem:[%s313_s7 + $0x8] sm:$0xff] %v167_v30  ;;  %v152_v32 = vmul.f32 %v148_v31, %v136_v27  ;;  %v153_v33 = vmul.f32 %v148_v31, %v137_v28 }
 0x273   :  { %v168_v35 = vadd.f32 %v164_v34, %v152_v32  ;;  %v169_v36 = vadd.f32 %v164_v34, %v153_v33 }
 0x275   :  { %172 = vst [vmem:[%s313_s7 + $0x10] sm:$0xff] %v168_v35  ;;  %173 = vst [vmem:[%s313_s7 + $0x18] sm:$0xff] %v169_v36 }

// kernel: coda_blocks_forward.9
= control target key start
LH: loop header
LB: loop body
LE: loop exit
PB: predicated region body
PF: predicated region fallthrough
CT: control target
= control target key end

     0   :  { %s91_s0 = inlined_call_operand.vmem [shape: f32[16,256], index: 0, kind: input, shape index: {}]   ;;  %s92_s1 = inlined_call_operand.vmem [shape: f32[16,256], index: 1, kind: output, shape index: {}]  }
   0x1   :  { %v8_v0 = vld [vmem:[%s91_s0] sm:$0xff]  ;;  %v9_v1 = vld [vmem:[%s91_s0 + $0x8] sm:$0xff]  ;;  %v10_v2 = vld [vmem:[%s91_s0 + $0x10] sm:$0xff] }
   0x2   :  { %v12_v3 = vadd.f32 %v9_v1, %v8_v0  ;;  %v11_v4 = vld [vmem:[%s91_s0 + $0x18] sm:$0xff] }
   0x3   :  { %v15_v5 = vadd.f32 %v11_v4, %v10_v2 }
   0x4   :  { %13 = vadd.xlane.f32.xlu0 %v12_v3 }
   0x8   :  { %16 = vadd.xlane.f32.xlu0 %v15_v5 }
  0x8d   :  { %v14_v6 = vpop.xlane.xlu0 %13 }
  0x8e   :  { %v19_v7 = vmul.f32 0.00390625, %v14_v6 }
  0x90   :  { %v21_v8 = vsub.f32 %v8_v0, %v19_v7  ;;  %v22_v9 = vsub.f32 %v9_v1, %v19_v7 }
  0x91   :  { %v17_v10 = vpop.xlane.xlu0 %16 }
  0x92   :  { %v20_v11 = vmul.f32 0.00390625, %v17_v10  ;;  %v25_v12 = vmul.f32 %v21_v8, %v21_v8  ;;  %v26_v13 = vmul.f32 %v22_v9, %v22_v9 }
  0x94   :  { %v23_v14 = vsub.f32 %v10_v2, %v20_v11  ;;  %v24_v15 = vsub.f32 %v11_v4, %v20_v11  ;;  %v29_v16 = vadd.f32 %v26_v13, %v25_v12 }
  0x96   :  { %30 = vadd.xlane.f32.xlu1 %v29_v16  ;;  %v27_v17 = vmul.f32 %v23_v14, %v23_v14  ;;  %v28_v18 = vmul.f32 %v24_v15, %v24_v15 }
  0x98   :  { %v32_v19 = vadd.f32 %v28_v18, %v27_v17 }
  0x9a   :  { %33 = vadd.xlane.f32.xlu1 %v32_v19 }
 0x11f   :  { %v31_v20 = vpop.xlane.xlu1 %30 }
 0x120   :  { %v35_v21 = vmul.f32 0.00390625, %v31_v20 }
 0x122   :  { %v37_v22 = vadd.f32 1e-05, %v35_v21 }
 0x123   :  { %v34_v23 = vpop.xlane.xlu1 %33 }
 0x124   :  { %53 = vrsqrt.f32 %v37_v22  ;;  %v36_v24 = vmul.f32 0.00390625, %v34_v23 }
 0x126   :  { %v38_v25 = vadd.f32 1e-05, %v36_v24 }
 0x128   :  { %55 = vrsqrt.f32 %v38_v25 }
 0x131   :  { %v54_v26 = vpop.eup %53 }
 0x132   :  { %v41_v27 = vmul.f32 %v54_v26, %v21_v8  ;;  %v42_v28 = vmul.f32 %v54_v26, %v22_v9 }
 0x134   :  { %45 = vst [vmem:[%s92_s1] sm:$0xff] %v41_v27  ;;  %46 = vst [vmem:[%s92_s1 + $0x8] sm:$0xff] %v42_v28 }
 0x135   :  { %v56_v29 = vpop.eup %55 }
 0x136   :  { %v43_v30 = vmul.f32 %v56_v29, %v23_v14  ;;  %v44_v31 = vmul.f32 %v56_v29, %v24_v15 }
 0x138   :  { %47 = vst [vmem:[%s92_s1 + $0x10] sm:$0xff] %v43_v30  ;;  %48 = vst [vmem:[%s92_s1 + $0x18] sm:$0xff] %v44_v31 }

// kernel: coda_blocks_forward.11
= control target key start
LH: loop header
LB: loop body
LE: loop exit
PB: predicated region body
PF: predicated region fallthrough
CT: control target
= control target key end

     0   :  { %v109_v3 = vmov 0   ;;  %s183_s0 = inlined_call_operand.vmem [shape: f32[16,256], index: 0, kind: input, shape index: {}]   ;;  %s184_s2 = inlined_call_operand.vmem [shape: f32[16,1], index: 2, kind: input, shape index: {}]   ;;  %s185_s3 = inlined_call_operand.vmem [shape: f32[16,1], index: 3, kind: input, shape index: {}]   ;;  %s186_s1 = inlined_call_operand.vmem [shape: f32[16,256], index: 1, kind: input, shape index: {}]   ;;  %s187_s4 = inlined_call_operand.vmem [shape: f32[16,256], index: 4, kind: output, shape index: {}]  }
   0x1   :  { %v17_v0 = vld [vmem:[%s183_s0] sm:$0xff]  ;;  %v18_v1 = vld [vmem:[%s183_s0 + $0x8] sm:$0xff]  ;;  %v19_v2 = vld [vmem:[%s183_s0 + $0x10] sm:$0xff]  ;;  %104 = vset.pattern.permute.xlu1 %v109_v3  ;;  %103 = vset.pattern.permute.xlu0 %v109_v3 }
   0x2   :  { %v21_v4 = vadd.f32 %v18_v1, %v17_v0  ;;  %v20_v5 = vld [vmem:[%s183_s0 + $0x18] sm:$0xff]  ;;  %v55_v6 = vld [vmem:[%s184_s2 + $0x8] sm:$0xff]  ;;  %v70_v8 = vld [vmem:[%s185_s3] sm:$0xff] }
   0x3   :  { %63 = vperm.xlu1 %104, %v55_v6   ;;  %v24_v7 = vadd.f32 %v20_v5, %v19_v2  ;;  %v54_v9 = vld [vmem:[%s184_s2] sm:$0xff]  ;;  %v71_v24 = vld [vmem:[%s185_s3 + $0x8] sm:$0xff]  ;;  %v88_v50 = vld [vmem:[%s186_s1 + $0x10] sm:$0xff] }
   0x4   :  { %22 = vadd.xlane.f32.xlu0 %v21_v4  ;;  %v86_v40 = vld [vmem:[%s186_s1] sm:$0xff]  ;;  %v87_v41 = vld [vmem:[%s186_s1 + $0x8] sm:$0xff]  ;;  %v89_v51 = vld [vmem:[%s186_s1 + $0x18] sm:$0xff] }
   0x7   :  { %74 = vperm.xlu1 %104, %v70_v8  }
   0x8   :  { %25 = vadd.xlane.f32.xlu0 %v24_v7 }
  0x1e   :  { %58 = vperm.xlu0 %103, %v54_v9  }
  0x7e   :  { %v64_v25 = vpop.permute.xlu1 %63 }
  0x82   :  { %v75_v26 = vpop.permute.xlu1 %74 }
  0x8d   :  { %v23_v10 = vpop.xlane.xlu0 %22 }
  0x8e   :  { %v28_v11 = vmul.f32 0.00390625, %v23_v10 }
  0x90   :  { %v30_v12 = vsub.f32 %v17_v0, %v28_v11  ;;  %v31_v13 = vsub.f32 %v18_v1, %v28_v11 }
  0x91   :  { %v26_v14 = vpop.xlane.xlu0 %25 }
  0x92   :  { %v29_v15 = vmul.f32 0.00390625, %v26_v14  ;;  %v34_v16 = vmul.f32 %v30_v12, %v30_v12  ;;  %v35_v17 = vmul.f32 %v31_v13, %v31_v13 }
  0x94   :  { %v32_v18 = vsub.f32 %v19_v2, %v29_v15  ;;  %v33_v19 = vsub.f32 %v20_v5, %v29_v15  ;;  %v38_v20 = vadd.f32 %v35_v17, %v34_v16 }
  0x96   :  { %39 = vadd.xlane.f32.xlu1 %v38_v20  ;;  %v36_v21 = vmul.f32 %v32_v18, %v32_v18  ;;  %v37_v22 = vmul.f32 %v33_v19, %v33_v19 }
  0x98   :  { %v41_v23 = vadd.f32 %v37_v22, %v36_v21 }
  0x99   :  { %v59_v34 = vpop.permute.xlu0 %58 }
  0x9a   :  { %42 = vadd.xlane.f32.xlu1 %v41_v23 }
  0xab   :  { %79 = vperm.xlu1 %104, %v71_v24  }
 0x11f   :  { %v40_v27 = vpop.xlane.xlu1 %39 }
 0x120   :  { %v44_v28 = vmul.f32 0.00390625, %v40_v27 }
 0x122   :  { %v46_v29 = vadd.f32 1e-05, %v44_v28 }
 0x123   :  { %v43_v30 = vpop.xlane.xlu1 %42 }
 0x124   :  { %105 = vrsqrt.f32 %v46_v29  ;;  %v45_v31 = vmul.f32 0.00390625, %v43_v30 }
 0x126   :  { %v47_v32 = vadd.f32 1e-05, %v45_v31 }
 0x127   :  { %v80_v52 = vpop.permute.xlu1 %79 }
 0x128   :  { %107 = vrsqrt.f32 %v47_v32 }
 0x131   :  { %v106_v33 = vpop.eup %105 }
 0x132   :  { %v50_v35 = vmul.f32 %v106_v33, %v30_v12  ;;  %v51_v36 = vmul.f32 %v106_v33, %v31_v13 }
 0x134   :  { %v66_v37 = vmul.f32 %v59_v34, %v50_v35  ;;  %v67_v38 = vmul.f32 %v59_v34, %v51_v36 }
 0x135   :  { %v108_v39 = vpop.eup %107 }
 0x136   :  { %v52_v42 = vmul.f32 %v108_v39, %v32_v18  ;;  %v53_v43 = vmul.f32 %v108_v39, %v33_v19  ;;  %v82_v44 = vadd.f32 %v75_v26, %v66_v37  ;;  %v83_v45 = vadd.f32 %v75_v26, %v67_v38 }
 0x138   :  { %v68_v46 = vmul.f32 %v64_v25, %v52_v42  ;;  %v69_v47 = vmul.f32 %v64_v25, %v53_v43  ;;  %v90_v48 = vadd.f32 %v86_v40, %v82_v44  ;;  %v91_v49 = vadd.f32 %v87_v41, %v83_v45 }
 0x13a   :  { %v84_v53 = vadd.f32 %v80_v52, %v68_v46  ;;  %v85_v54 = vadd.f32 %v80_v52, %v69_v47  ;;  %94 = vst [vmem:[%s187_s4] sm:$0xff] %v90_v48  ;;  %95 = vst [vmem:[%s187_s4 + $0x8] sm:$0xff] %v91_v49 }
 0x13c   :  { %v92_v55 = vadd.f32 %v88_v50, %v84_v53  ;;  %v93_v56 = vadd.f32 %v89_v51, %v85_v54 }
 0x13e   :  { %96 = vst [vmem:[%s187_s4 + $0x10] sm:$0xff] %v92_v55  ;;  %97 = vst [vmem:[%s187_s4 + $0x18] sm:$0xff] %v93_v56 }

</bundles_post_ra>
